<compile_context>
chip_gen: v6e
topology: v6e:2x2x1
jax: 0.10.0
libtpu: 0.0.40
codegen_flags: <defaults>
</compile_context>

<pallas_src>
import functools

import jax
import jax.numpy as jnp
from jax.experimental import pallas as pl
from jax.experimental.pallas import tpu as pltpu


def _round_up(n: int, m: int) -> int:
    return ((n + m - 1) // m) * m


def _residual_kernel(x_ref, alpha_ref, beta_ref, w_ref, b_ref, *rest,
                     eps: float, dropout_p: float, keep_threshold: int):
    if dropout_p > 0.0:
        rbits_ref, o_ref = rest
    else:
        (o_ref,) = rest

    x = x_ref[...].astype(jnp.float32)                     # (TR, F)
    feats = x.shape[-1]                                    # note: F == 1 degenerates (F-1 == 0)

    # ---- LayerNormalization (torch semantics: unbiased std, eps added to std) ----
    mean = jnp.mean(x, axis=-1, keepdims=True)
    centered = x - mean
    var_unbiased = jnp.sum(centered * centered, axis=-1, keepdims=True) / (feats - 1)
    # Narrow (TR,1) reciprocal instead of dividing the whole (TR,F) tile.
    inv = 1.0 / (jnp.sqrt(var_unbiased) + eps)
    normed = centered * inv * alpha_ref[...] + beta_ref[...]

    # ---- sublayer: Linear(F -> F) on the MXU, bf16 operands / f32 accumulate ----
    sub = jnp.dot(normed.astype(w_ref.dtype), w_ref[...],
                  preferred_element_type=jnp.float32) + b_ref[...]

    # ---- dropout (train mode, inverted scaling) ----
    if dropout_p > 0.0:
        keep_prob = 1.0 - dropout_p
        scale = (1.0 / keep_prob) if keep_prob > 0.0 else 0.0
        # rbits is iid uniform int32 over [-2^31, 2^31); P(rbits < t) == keep_prob.
        keep = rbits_ref[...] < jnp.int32(keep_threshold)
        sub = jnp.where(keep, sub * scale, 0.0)

    # ---- residual add ----
    o_ref[...] = (x + sub).astype(o_ref.dtype)


def residual_connection(x, alpha, beta, w, b, key=None, *,
                        dropout_p: float = 0.1, eps: float = 1e-6,
                        row_tile: int = 256, matmul_dtype=jnp.bfloat16):
    """x: (B, S, F); alpha, beta, b: (F,); w: (F, F); key: jax PRNG key for dropout.

    row_tile is a tunable: 128-256 on v5e, 256-512 on v6e/v7x.
    """
    B, S, F = x.shape
    rows = B * S

    # Effective row tile: clamp to the (8-rounded) problem size so tiny smoke
    # tests don't pad up to 256 rows, then pad rows so the grid divides evenly.
    row_tile_eff = _round_up(min(int(row_tile), _round_up(rows, 8)), 8)
    rows_pad = _round_up(rows, row_tile_eff)
    grid = (rows_pad // row_tile_eff,)

    xf = x.reshape(rows, F)
    if rows_pad != rows:
        xf = jnp.pad(xf, ((0, rows_pad - rows), (0, 0)))

    alpha2 = alpha.reshape(1, F).astype(jnp.float32)
    beta2 = beta.reshape(1, F).astype(jnp.float32)
    b2 = b.reshape(1, F).astype(jnp.float32)
    w_mm = w.astype(matmul_dtype)

    keep_prob = 1.0 - float(dropout_p)
    # Integer dropout threshold for signed int32 uniforms.
    keep_threshold = int(round(keep_prob * (1 << 32))) - (1 << 31)
    keep_threshold = max(-(1 << 31), min(keep_threshold, (1 << 31) - 1))

    row_spec = pl.BlockSpec((row_tile_eff, F), lambda i: (i, 0))
    const_row = pl.BlockSpec((1, F), lambda i: (0, 0))
    w_spec = pl.BlockSpec((F, F), lambda i: (0, 0))
    # TODO(synk): for very large F on v7x (64 MiB VMEM) the resident (F,F) weight is
    # still double-buffered; single-buffer it (pipeline_mode=pl.Buffered(1)) or add an
    # output-feature grid axis and raise vmem_limit_bytes.

    inputs = [xf, alpha2, beta2, w_mm, b2]
    in_specs = [row_spec, const_row, const_row, w_spec, const_row]

    if dropout_p > 0.0:
        if key is None:
            key = jax.random.PRNGKey(0)
        # TODO(synk): torch's dropout RNG stream cannot be reproduced bit-exactly; we
        # draw uniform bits with jax.random in the wrapper (portable, unlike
        # pltpu.prng_*) and do the Bernoulli(keep_prob) threshold in-kernel.
        rbits = jax.random.bits(key, (rows_pad, F), dtype=jnp.uint32)
        rbits = jax.lax.bitcast_convert_type(rbits, jnp.int32)
        inputs.append(rbits)
        in_specs.append(pl.BlockSpec((row_tile_eff, F), lambda i: (i, 0)))

    kernel = functools.partial(_residual_kernel, eps=float(eps),
                               dropout_p=float(dropout_p),
                               keep_threshold=keep_threshold)

    out = pl.pallas_call(
        kernel,
        out_shape=jax.ShapeDtypeStruct((rows_pad, F), x.dtype),
        grid=grid,
        in_specs=in_specs,
        out_specs=row_spec,
        compiler_params=pltpu.CompilerParams(
            dimension_semantics=("parallel",)),  # row blocks independent -> megacore
    )(*inputs)

    return out[:rows].reshape(B, S, F)


if __name__ == "__main__":
    B, S, F = 2, 8, 32
    key = jax.random.PRNGKey(0)
    kx, kw, kb, kd = jax.random.split(key, 4)

    x = jax.random.normal(kx, (B, S, F), dtype=jnp.float32)

    # LayerNormalization parameters (module init: ones / zeros)
    alpha = jnp.ones((F,), dtype=jnp.float32)
    beta = jnp.zeros((F,), dtype=jnp.float32)

    # Synthetic sublayer (Linear F->F) parameters, deterministic init
    w = jax.random.normal(kw, (F, F), dtype=jnp.float32) * 0.05
    b = jax.random.normal(kb, (F,), dtype=jnp.float32) * 0.01

    out = residual_connection(x, alpha, beta, w, b, key=kd,
                              dropout_p=0.1, eps=1e-6, row_tile=256)
    jax.block_until_ready(out)
    assert out.shape == (B, S, F) and out.dtype == x.dtype
    assert bool(jnp.all(jnp.isfinite(out)))
    print("KERNEL_OK")
</pallas_src>

<mosaic_0001>
module attributes {stable_mosaic.version = 11 : i64} {
  func.func @_residual_kernel(%arg0: i32, %arg1: memref<16x32xf32, #tpu.memory_space<vmem>>, %arg2: memref<1x32xf32, #tpu.memory_space<vmem>>, %arg3: memref<1x32xf32, #tpu.memory_space<vmem>>, %arg4: memref<32x32xbf16, #tpu.memory_space<vmem>>, %arg5: memref<1x32xf32, #tpu.memory_space<vmem>>, %arg6: memref<16x32xi32, #tpu.memory_space<vmem>>, %arg7: memref<16x32xf32, #tpu.memory_space<vmem>>) attributes {dimension_semantics = [#tpu.dimension_semantics<parallel>], iteration_bounds = array<i64: 1>, scalar_prefetch = 0 : i64, scratch_operands = 0 : i64, tpu.core_type = #tpu.core_type<tc>, window_params = [{transform_indices = @transform_0, window_bounds = array<i64: 16, 32>}, {pipeline_mode = #tpu.pipeline_mode<synchronous>, transform_indices = @transform_1, window_bounds = array<i64: 1, 32>}, {pipeline_mode = #tpu.pipeline_mode<synchronous>, transform_indices = @transform_2, window_bounds = array<i64: 1, 32>}, {pipeline_mode = #tpu.pipeline_mode<synchronous>, transform_indices = @transform_3, window_bounds = array<i64: 32, 32>}, {pipeline_mode = #tpu.pipeline_mode<synchronous>, transform_indices = @transform_4, window_bounds = array<i64: 1, 32>}, {transform_indices = @transform_5, window_bounds = array<i64: 16, 32>}, {transform_indices = @transform_6, window_bounds = array<i64: 16, 32>}]} {
    %c0 = arith.constant 0 : index
    %c0_0 = arith.constant 0 : index
    %0 = vector.load %arg1[%c0, %c0_0] : memref<16x32xf32, #tpu.memory_space<vmem>>, vector<16x32xf32>
    %cst = arith.constant dense<0.000000e+00> : vector<16xf32>
    %1 = vector.multi_reduction <add>, %0, %cst [1] : vector<16x32xf32> to vector<16xf32>
    %2 = vector.shape_cast %1 : vector<16xf32> to vector<16x1xf32>
    %cst_1 = arith.constant 3.200000e+01 : f32
    %3 = vector.broadcast %cst_1 : f32 to vector<16x1xf32>
    %4 = arith.divf %2, %3 : vector<16x1xf32>
    %5 = vector.broadcast %4 : vector<16x1xf32> to vector<16x32xf32>
    %6 = arith.subf %0, %5 : vector<16x32xf32>
    %7 = arith.mulf %6, %6 : vector<16x32xf32>
    %cst_2 = arith.constant dense<0.000000e+00> : vector<16xf32>
    %8 = vector.multi_reduction <add>, %7, %cst_2 [1] : vector<16x32xf32> to vector<16xf32>
    %9 = vector.shape_cast %8 : vector<16xf32> to vector<16x1xf32>
    %cst_3 = arith.constant 3.100000e+01 : f32
    %10 = vector.broadcast %cst_3 : f32 to vector<16x1xf32>
    %11 = arith.divf %9, %10 : vector<16x1xf32>
    %12 = math.sqrt %11 : vector<16x1xf32>
    %cst_4 = arith.constant 9.99999997E-7 : f32
    %13 = vector.broadcast %cst_4 : f32 to vector<16x1xf32>
    %14 = arith.addf %12, %13 : vector<16x1xf32>
    %cst_5 = arith.constant 1.000000e+00 : f32
    %15 = vector.broadcast %cst_5 : f32 to vector<16x1xf32>
    %16 = arith.divf %15, %14 : vector<16x1xf32>
    %17 = vector.broadcast %16 : vector<16x1xf32> to vector<16x32xf32>
    %18 = arith.mulf %6, %17 : vector<16x32xf32>
    %c0_6 = arith.constant 0 : index
    %c0_7 = arith.constant 0 : index
    %19 = vector.load %arg2[%c0_6, %c0_7] : memref<1x32xf32, #tpu.memory_space<vmem>>, vector<1x32xf32>
    %20 = vector.broadcast %19 : vector<1x32xf32> to vector<16x32xf32>
    %21 = arith.mulf %18, %20 : vector<16x32xf32>
    %c0_8 = arith.constant 0 : index
    %c0_9 = arith.constant 0 : index
    %22 = vector.load %arg3[%c0_8, %c0_9] : memref<1x32xf32, #tpu.memory_space<vmem>>, vector<1x32xf32>
    %23 = vector.broadcast %22 : vector<1x32xf32> to vector<16x32xf32>
    %24 = arith.addf %21, %23 : vector<16x32xf32>
    %25 = arith.truncf %24 : vector<16x32xf32> to vector<16x32xbf16>
    %c0_10 = arith.constant 0 : index
    %c0_11 = arith.constant 0 : index
    %26 = vector.load %arg4[%c0_10, %c0_11] : memref<32x32xbf16, #tpu.memory_space<vmem>>, vector<32x32xbf16>
    %cst_12 = arith.constant dense<0.000000e+00> : vector<16x32xf32>
    %27 = tpu.matmul %25, %26, %cst_12 {dimension_numbers = #tpu.dot_dimension_numbers<[1], [0], [0], [1], [0, 0, 1, 1], [], []>} : vector<16x32xbf16>, vector<32x32xbf16>, vector<16x32xf32> -> vector<16x32xf32>
    %c0_13 = arith.constant 0 : index
    %c0_14 = arith.constant 0 : index
    %28 = vector.load %arg5[%c0_13, %c0_14] : memref<1x32xf32, #tpu.memory_space<vmem>>, vector<1x32xf32>
    %29 = vector.broadcast %28 : vector<1x32xf32> to vector<16x32xf32>
    %30 = arith.addf %27, %29 : vector<16x32xf32>
    %c0_15 = arith.constant 0 : index
    %c0_16 = arith.constant 0 : index
    %31 = vector.load %arg6[%c0_15, %c0_16] : memref<16x32xi32, #tpu.memory_space<vmem>>, vector<16x32xi32>
    %c1717986918_i32 = arith.constant 1717986918 : i32
    %32 = vector.broadcast %c1717986918_i32 : i32 to vector<16x32xi32>
    %33 = arith.cmpi slt, %31, %32 : vector<16x32xi32>
    %cst_17 = arith.constant 1.11111116 : f32
    %34 = vector.broadcast %cst_17 : f32 to vector<16x32xf32>
    %35 = arith.mulf %30, %34 : vector<16x32xf32>
    %cst_18 = arith.constant 0.000000e+00 : f32
    %36 = vector.broadcast %cst_18 : f32 to vector<16x32xf32>
    %37 = arith.select %33, %35, %36 : vector<16x32xi1>, vector<16x32xf32>
    %38 = arith.addf %0, %37 : vector<16x32xf32>
    %c0_19 = arith.constant 0 : index
    %c0_20 = arith.constant 0 : index
    %39 = vector.load %arg7[%c0_19, %c0_20] : memref<16x32xf32, #tpu.memory_space<vmem>>, vector<16x32xf32>
    tpu.vector_store %arg7[%c0_19, %c0_20], %38 {strides = array<i32>} : memref<16x32xf32, #tpu.memory_space<vmem>>, vector<16x32xf32>,
    return
  }
  func.func @transform_0(%arg0: i32) -> (i32, i32) {
    %c0_i32 = arith.constant 0 : i32
    %c0_i32_0 = arith.constant 0 : i32
    return %arg0, %c0_i32 : i32, i32
  }
  func.func @transform_1(%arg0: i32) -> (i32, i32) {
    %c0_i32 = arith.constant 0 : i32
    %c0_i32_0 = arith.constant 0 : i32
    %c0_i32_1 = arith.constant 0 : i32
    return %c0_i32, %c0_i32_0 : i32, i32
  }
  func.func @transform_2(%arg0: i32) -> (i32, i32) {
    %c0_i32 = arith.constant 0 : i32
    %c0_i32_0 = arith.constant 0 : i32
    %c0_i32_1 = arith.constant 0 : i32
    return %c0_i32, %c0_i32_0 : i32, i32
  }
  func.func @transform_3(%arg0: i32) -> (i32, i32) {
    %c0_i32 = arith.constant 0 : i32
    %c0_i32_0 = arith.constant 0 : i32
    %c0_i32_1 = arith.constant 0 : i32
    return %c0_i32, %c0_i32_0 : i32, i32
  }
  func.func @transform_4(%arg0: i32) -> (i32, i32) {
    %c0_i32 = arith.constant 0 : i32
    %c0_i32_0 = arith.constant 0 : i32
    %c0_i32_1 = arith.constant 0 : i32
    return %c0_i32, %c0_i32_0 : i32, i32
  }
  func.func @transform_5(%arg0: i32) -> (i32, i32) {
    %c0_i32 = arith.constant 0 : i32
    %c0_i32_0 = arith.constant 0 : i32
    return %arg0, %c0_i32 : i32, i32
  }
  func.func @transform_6(%arg0: i32) -> (i32, i32) {
    %c0_i32 = arith.constant 0 : i32
    %c0_i32_0 = arith.constant 0 : i32
    return %arg0, %c0_i32 : i32, i32
  }
}

</mosaic_0001>

<bundles_post_ra>
// kernel: tpu_custom_call.1
= control target key start
LH: loop header
LB: loop body
LE: loop exit
PB: predicated region body
PF: predicated region fallthrough
CT: control target
= control target key end

     0   :  { %11 = vsyncpa [#allocation3], 0  ;;  %s444_s0 = inlined_call_operand.hbm [shape: f32[16,32], index: 0, kind: input, shape index: {}]   ;;  %s445_s1 = inlined_call_operand.vmem [shape: f32[1,32], index: 1, kind: input, shape index: {}]   ;;  %s446_s2 = inlined_call_operand.vmem [shape: f32[1,32], index: 2, kind: input, shape index: {}]   ;;  %s447_s3 = inlined_call_operand.hbm [shape: bf16[32,32], index: 3, kind: input, shape index: {}]   ;;  %s448_s4 = inlined_call_operand.vmem [shape: f32[1,32], index: 4, kind: input, shape index: {}]   ;;  %s449_s5 = inlined_call_operand.hbm [shape: s32[16,32], index: 5, kind: input, shape index: {}]   ;;  %s450_s6 = inlined_call_operand.hbm [shape: f32[16,32], index: 6, kind: output, shape index: {}]  }
   0x1   :  { %12 = vsyncpa [#allocation6], 0 }
   0x2   :  { %13 = vsyncpa [#allocation4], 0  ;;  %s352_s21 = smov [#allocation5]  }
   0x3   :  { %s35_s22 = sshll.u32 %s352_s21, 4  ;;  %s36_s22 = int_to_ptr.vmem [resolvable:$true] %s35_s22 }
   0x4   :  { %s274_s23 = scalar_lea.vmem %s36_s22, 256  ;;  %p279_p1 = scmp.lt.s32.totalorder %s36_s22, %s36_s22 }
   0x5   :  { %p275_p0 = scmp.ne.s32.totalorder %s36_s22, %s274_s23  ;;  %p280_p2 = scmp.lt.s32.totalorder %s274_s23, %s274_s23 }
   0x7   :  { %p281_p3 = por %p280_p2, %p279_p1 }
   0x9   :  { %p282_p4 = pnand %p281_p3, %p275_p0 }
   0xb   :  { %285 = shalt.err (!%p282_p4)
}
   0xc   :  { %s353_s24 = smov 64   ;;  %s354_s25 = smov 4  }
   0xd   :  { %41 = dma.hbm_to_vmem [thread:$0]  %s447_s3, 256, %s36_s22, [#allocation6], %s353_s24, %s353_s24, %s354_s25  }
   0xe   :  { %s355_s28 = smov [#allocation2]  }
   0xf   :  { %s19_s29 = sshll.u32 %s355_s28, 4  ;;  %s20_s29 = int_to_ptr.vmem [resolvable:$true] %s19_s29 }
  0x10   :  { %s294_s30 = scalar_lea.vmem %s20_s29, 256  ;;  %p299_p6 = scmp.lt.s32.totalorder %s20_s29, %s20_s29 }
  0x11   :  { %p295_p5 = scmp.ne.s32.totalorder %s20_s29, %s294_s30  ;;  %p300_p7 = scmp.lt.s32.totalorder %s294_s30, %s294_s30 }
  0x13   :  { %p301_p8 = por %p300_p7, %p299_p6 }
  0x15   :  { %p302_p9 = pnand %p301_p8, %p295_p5 }
  0x17   :  { %305 = shalt.err (!%p302_p9)
}
  0x18   :  { %s356_s7 = smov 128   ;;  %s357_s8 = smov 8  }
  0x19   :  { %25 = dma.hbm_to_vmem [thread:$0]  %s444_s0, 256, %s20_s29, [#allocation3], %s356_s7, %s356_s7, %s357_s8  }
  0x1a   :  { %s358_s3 = smov [#allocation7]  }
  0x1b   :  { %s49_s11 = sshll.u32 %s358_s3, 4  ;;  %s50_s11 = int_to_ptr.vmem [resolvable:$true] %s49_s11 }
  0x1c   :  { %s314_s12 = scalar_lea.vmem %s50_s11, 256  ;;  %p319_p11 = scmp.lt.s32.totalorder %s50_s11, %s50_s11 }
  0x1d   :  { %p315_p10 = scmp.ne.s32.totalorder %s50_s11, %s314_s12  ;;  %p320_p12 = scmp.lt.s32.totalorder %s314_s12, %s314_s12 }
  0x1f   :  { %p321_p13 = por %p320_p12, %p319_p11 }
  0x21   :  { %p322_p0 = pnand %p321_p13, %p315_p10 }
  0x23   :  { %325 = shalt.err (!%p322_p0)
}
  0x24   :  { %55 = dma.hbm_to_vmem [thread:$0]  %s449_s5, 256, %s50_s11, [#allocation6], %s356_s7, %s356_s7, %s357_s8  }
  0x25   :  { %346 = dma.done.wait [#allocation3], 256  }
  0x26   :  { %347 = vsyncadd [#allocation3], 4294967040 }
  0x27   :  { %348 = dma.done.wait [#allocation6], 512  }
  0x28   :  { %349 = vsyncadd [#allocation6], 4294966784  ;;  %vm68_vm0 = vcmask 261120   ;;  %v412_v0 = vld [vmem:[#allocation2] sm:$0xff]  ;;  %v414_v1 = vld [vmem:[#allocation2 + $0x8] sm:$0xff]  ;;  %v359_v15 = vmov 0.0  }
  0x29   :  { %v69_v2 = vsel %vm68_vm0, %v412_v0, 0.0  ;;  %v72_v3 = vsel %vm68_vm0, %v414_v1, 0.0  ;;  %v256_v14 = vld [vmem:[#allocation5 + $0x8] sm:$0xff]   ;;  %238 = vmatprep.subr.bf16.mxu0 %v359_v15  ;;  %vm360_vm1 = vmmov 0   ;;  %v257_v16 = vld [vmem:[#allocation5] sm:$0xff]   ;;  %v199_v45 = vld [vmem:[#allocation7] sm:$0xff] }
  0x2a   :  { %70 = vadd.xlane.f32.xlu0 %v69_v2  ;;  %242 = vmatprep.mubr.msk.bf16.mxu0 %vm360_vm1, %v359_v15  ;;  %v229_v35 = vld [vmem:[%s445_s1] ss:$0 sm:$0xff]  ;;  %vm201_vm6 = vcmp.lt.s32.totalorder %v199_v45, 1717986918  ;;  %v200_v50 = vld [vmem:[#allocation7 + $0x8] sm:$0xff]  ;;  %s361_s1 = smov [#allocation8]  }
  0x2b   :  { %239 = vmatpush3.bf16.msra.mxu0 %v256_v14  ;;  %v230_v39 = vld [vmem:[%s446_s2] ss:$0 sm:$0xff]  ;;  %vm202_vm7 = vcmp.lt.s32.totalorder %v200_v50, 1717986918  ;;  %s216_s2 = sshll.u32 %s361_s1, 4  ;;  %s217_s2 = int_to_ptr.vmem [resolvable:$true] %s216_s2 }
  0x2c   :  { %240 = vmatprep.subr.bf16.mxu0 %v359_v15  ;;  %v231_v44 = vld [vmem:[%s448_s4] ss:$0 sm:$0xff]  ;;  %s326_s4 = scalar_lea.vmem %s217_s2, 256  ;;  %p331_p2 = scmp.lt.s32.totalorder %s217_s2, %s217_s2 }
  0x2d   :  { %p327_p1 = scmp.ne.s32.totalorder %s217_s2, %s326_s4  ;;  %p332_p3 = scmp.lt.s32.totalorder %s326_s4, %s326_s4 }
  0x2e   :  { %73 = vadd.xlane.f32.xlu0 %v72_v3 }
  0x2f   :  { %241 = vmatpush3.bf16.msra.mxu0 %v257_v16  ;;  %p333_p4 = por %p332_p3, %p331_p2 }
  0x31   :  { %p334_p5 = pnand %p333_p4, %p327_p1 }
  0xb3   :  { %v71_v4 = vpop.xlane.xlu0 %70 }
  0xb4   :  { %v76_v5 = vmul.f32 0.03125, %v71_v4 }
  0xb6   :  { %v78_v6 = vsub.f32 %v412_v0, %v76_v5 }
  0xb7   :  { %v74_v7 = vpop.xlane.xlu0 %73 }
  0xb8   :  { %v77_v8 = vmul.f32 0.03125, %v74_v7  ;;  %v80_v9 = vmul.f32 %v78_v6, %v78_v6 }
  0xba   :  { %v79_v10 = vsub.f32 %v414_v1, %v77_v8  ;;  %v82_v11 = vsel %vm68_vm0, %v80_v9, 0.0 }
  0xbb   :  { %83 = vadd.xlane.f32.xlu1 %v82_v11 }
  0xbc   :  { %v81_v12 = vmul.f32 %v79_v10, %v79_v10 }
  0xbe   :  { %v85_v13 = vsel %vm68_vm0, %v81_v12, 0.0 }
  0xbf   :  { %86 = vadd.xlane.f32.xlu1 %v85_v13 }
 0x144   :  { %v84_v17 = vpop.xlane.xlu1 %83 }
 0x145   :  { %v89_v18 = vmul.f32 0.032258064, %v84_v17 }
 0x147   :  { %258 = vrsqrt.f32 %v89_v18  ;;  %vm93_vm2 = vcmp.eq.f32.partialorder %v89_v18, inf  ;;  %v96_v23 = vand.u32 2147483648, %v89_v18  ;;  %vm95_vm3 = vcmp.eq.f32.partialorder %v89_v18, 0.0 }
 0x148   :  { %v87_v19 = vpop.xlane.xlu1 %86 }
 0x149   :  { %v90_v20 = vmul.f32 0.032258064, %v87_v19 }
 0x14b   :  { %260 = vrsqrt.f32 %v90_v20  ;;  %vm100_vm4 = vcmp.eq.f32.partialorder %v90_v20, inf  ;;  %v103_v29 = vand.u32 2147483648, %v90_v20  ;;  %vm102_vm5 = vcmp.eq.f32.partialorder %v90_v20, 0.0 }
 0x154   :  { %v259_v21 = vpop.eup %258 }
 0x155   :  { %v92_v22 = vmul.f32 %v259_v21, %v89_v18 }
 0x157   :  { %v94_v24 = vsel %vm93_vm2, %v89_v18, %v92_v22 }
 0x158   :  { %v261_v25 = vpop.eup %260  ;;  %v97_v26 = vsel %vm95_vm3, %v96_v23, %v94_v24 }
 0x159   :  { %v105_v27 = vadd.f32 1e-06, %v97_v26  ;;  %v99_v28 = vmul.f32 %v261_v25, %v90_v20 }
 0x15b   :  { %262 = vrcp.f32 %v105_v27  ;;  %v101_v30 = vsel %vm100_vm4, %v90_v20, %v99_v28 }
 0x15c   :  { %v104_v31 = vsel %vm102_vm5, %v103_v29, %v101_v30 }
 0x15d   :  { %v106_v32 = vadd.f32 1e-06, %v104_v31 }
 0x15f   :  { %264 = vrcp.f32 %v106_v32 }
 0x168   :  { %v263_v33 = vpop.eup %262 }
 0x169   :  { %v111_v34 = vmul.f32 %v263_v33, %v78_v6 }
 0x16b   :  { %v120_v38 = vmul.f32 %v229_v35, %v111_v34 }
 0x16c   :  { %v265_v36 = vpop.eup %264 }
 0x16d   :  { %v112_v37 = vmul.f32 %v265_v36, %v79_v10  ;;  %v129_v41 = vadd.f32 %v230_v39, %v120_v38 }
 0x16f   :  { %v121_v40 = vmul.f32 %v229_v35, %v112_v37 }
 0x171   :  { %v130_v42 = vadd.f32 %v230_v39, %v121_v40 }
 0x173   :  { %v131_v43 = vpack.c.bf16 %v130_v42, %v129_v41 }
 0x175   :  { %243 = vmatmul.mubr.msk.bf16.vlgmr.msra.gmra.mxu0 %vm68_vm0, %v131_v43 }
 0x235   :  { %v192_v46 = vpop.f32.mrf.mxu0 }
 0x236   :  { %v193_v47 = vadd.f32 %v231_v44, %v192_v46 }
 0x237   :  { %v244_v48 = vpop.f32.mrf.mxu0 }
 0x238   :  { %v203_v49 = vmul.f32 1.1111112, %v193_v47 }
 0x239   :  { %v195_v51 = vpop.f32.mrf.mxu0 }
 0x23a   :  { %v205_v52 = vsel %vm201_vm6, %v203_v49, 0.0  ;;  %v196_v53 = vadd.f32 %v231_v44, %v195_v51 }
 0x23b   :  { %v207_v54 = vadd.f32 %v205_v52, %v412_v0  ;;  %v245_v55 = vpop.f32.mrf.mxu0 }
 0x23c   :  { %v204_v56 = vmul.f32 1.1111112, %v196_v53 }
 0x23d   :  { %209 = vst.msk [vmem:[#allocation8] sm:$0xff] %vm68_vm0, %v207_v54 }
 0x23e   :  { %v206_v57 = vsel %vm202_vm7, %v204_v56, 0.0 }
 0x23f   :  { %v208_v58 = vadd.f32 %v206_v57, %v414_v1 }
 0x241   :  { %210 = vst.msk [vmem:[#allocation8 + $0x8] sm:$0xff] %vm68_vm0, %v208_v58 }
 0x242   :  { %337 = shalt.err (!%p334_p5)
}
 0x243   :  { %222 = dma.vmem_to_hbm [thread:$0]  %s217_s2, 256, %s450_s6, [#allocation4], %s356_s7, %s356_s7, %s357_s8  }
 0x244   :  { %350 = dma.done.wait [#allocation4], 256  }
 0x245   :  { %351 = vsyncadd [#allocation4], 4294967040 }
 0x246   :  { %226 = vsyncpa [#allocation3], 1 }
 0x247   :  { %227 = vsyncpa [#allocation6], 1 }
 0x248   :  { %228 = vsyncpa [#allocation4], 1 }

</bundles_post_ra>
